<compile_context>
chip_gen: v7x
topology: tpu7x:2x2x1
jax: 0.10.0
libtpu: 0.0.40
codegen_flags: <defaults>
</compile_context>

<pallas_src>
import functools
import math

import jax
import jax.numpy as jnp
from jax.experimental import pallas as pl
from jax.experimental.pallas import tpu as pltpu


def _conv_stats_kernel(x_ref, w_ref, y_ref, stats_ref, acc_ref, *, TH, KH):
    """Pass 1: conv for one (sample, row-tile) + lane-dense BN partial sums.

    x_ref    : (TH+KH-1, WCK)  haloed, lane-packed, K-padded input row tile
    w_ref    : (KH, WCK, WC)   banded weight (one deep-K matrix per tap row)
    y_ref    : (TH, WC)        conv output slab tile (lane dense)
    stats_ref: (8, WC)         rows 0/1 = per-lane sum / sum-of-squares
    acc_ref  : (TH, WC) f32    VMEM accumulator (bounds vreg pressure)
    """
    # Conv as KH deep-K matmuls on the MXU (K = WCK lanes, zero-padded rows of
    # the band contribute nothing).  Each tap is a sublane-offset slice of the
    # resident tile -> no per-tap relayouts.  f32 accumulation in VMEM scratch.
    acc_ref[...] = jnp.dot(x_ref[pl.ds(0, TH), :], w_ref[0],
                           preferred_element_type=jnp.float32)
    for kh in range(1, KH):                      # static unroll over taps
        acc_ref[...] += jnp.dot(x_ref[pl.ds(kh, TH), :], w_ref[kh],
                                preferred_element_type=jnp.float32)
    acc = acc_ref[...]
    y_ref[...] = acc.astype(y_ref.dtype)         # lane-dense store

    # Lane-dense BN partials (sublane reduce on the XLU, idle here); the tiny
    # (Wo,Cout)->Cout fold happens in the wrapper so no lane-splitting reshape
    # or masked narrow stores are needed in-kernel.
    s1 = jnp.sum(acc, axis=0, keepdims=True)            # (1, WC)
    s2 = jnp.sum(acc * acc, axis=0, keepdims=True)      # (1, WC)
    row = jax.lax.broadcasted_iota(jnp.int32, stats_ref.shape, 0)
    stats_ref[...] = jnp.where(row == 0, s1, jnp.where(row == 1, s2, 0.0))


def _norm_act_kernel(y_ref, s_ref, b_ref, o_ref):
    """Pass 2: fused BN affine + ReLU:  out = max(conv * scale + shift, 0)."""
    y = y_ref[...].astype(jnp.float32)
    o_ref[...] = jnp.maximum(y * s_ref[...] + b_ref[...], 0.0).astype(o_ref.dtype)


def _pick_row_tile(total, cap):
    """Largest row tile <= cap: the full extent, else a multiple-of-8 divisor."""
    if total <= cap:
        return total
    for th in range(cap - cap % 8, 7, -8):
        if total % th == 0:
            return th
    return total


def conv_norm_act(x_nchw, weight_oihw, gamma, beta, *, kernel_size,
                  stride=1, eps=1e-6, compute_dtype=jnp.bfloat16):
    """ConvNormAct forward. x_nchw: (N, Cin, H, W); weight: (Cout, Cin, K, K)."""
    # TODO(synk): stride!=1 / dilation!=1 / groups!=1 conv variants not
    # implemented (module defaults used here).
    assert stride == 1
    N, Cin, H, W = x_nchw.shape
    Cout = weight_oihw.shape[0]
    K = kernel_size
    pad = math.ceil((K - stride) / 2)
    Ho = H + 2 * pad - K + 1
    Wo = W + 2 * pad - K + 1
    Hp, Wp = H + 2 * pad, W + 2 * pad
    WC = Wo * Cout                          # lane-dense output width (128 here)
    WCin = Wp * Cin                         # lane-packed input width (matmul K)
    WCK = ((WCin + 127) // 128) * 128       # K dim padded to full 128-lane vregs

    # Generation-aware VMEM budget (v5e/v6e 128 MiB, v7x 64 MiB physical).
    try:
        vmem_cap = int(pltpu.get_tpu_info().vmem_capacity_bytes)
    except Exception:  # conservative fallback (v7x-sized)
        vmem_cap = 64 * 1024 * 1024
    vmem_budget = min(vmem_cap * 3 // 4, 96 * 1024 * 1024)

    # Row tiling: one whole sample per tile when it fits (no halo copy at all);
    # otherwise multiple-of-8 row tiles with a (K-1)-row halo window.
    TH = _pick_row_tile(Ho, 256)
    nt = Ho // TH
    THp = TH + K - 1

    # ---- JAX glue: NCHW->NHWC, zero pad, lane-pack rows, pad K dim to 128,
    # cast to the MXU feed dtype (bf16 default: native bf16 MXU + half the
    # input-side DMA bytes; all accumulation stays f32 inside the kernel).
    xp = jnp.pad(jnp.transpose(x_nchw, (0, 2, 3, 1)),
                 ((0, 0), (pad, pad), (pad, pad), (0, 0)))
    xp2 = jnp.pad(xp.reshape(N, Hp, WCin),
                  ((0, 0), (0, 0), (0, WCK - WCin))).astype(compute_dtype)
    if nt == 1:
        xp_t = xp2[:, None]                 # pure reshape: no extra HBM copy
    else:
        # TODO(synk): at TH>=128 the (K-1)/TH halo replication is negligible;
        # for fully copy-free overlapping windows use memory_space=pl.ANY +
        # pltpu.make_async_copy over pl.ds(t*TH, TH+K-1) row windows.
        xp_t = jnp.stack([xp2[:, t * TH:t * TH + THp, :] for t in range(nt)],
                         axis=1)

    # ---- banded weight (K, WCK, WC) built with one one-hot einsum (no traced
    # scatter loops):  band[kh, (wo+kw)*Cin + c, wo*Cout + co] = w[co, c, kh, kw]
    # TODO(synk): at production sizes tile the band along the output-lane dim
    # (extra grid axis, lane width >=256 for v6e/v7x MXUs) or switch to a
    # pltpu.roll shifted-matmul (KH*KW, Cin, Cout) form: band grows as
    # KH*Wp*Wo*Cin*Cout (over v7x's 64 MiB VMEM) and its mostly-zero K dim
    # wastes ~Wp/KW MXU FLOPs, which bites first on v5e.
    w_hwio = jnp.transpose(weight_oihw, (2, 3, 1, 0)).astype(jnp.float32)
    onehot = (jnp.arange(K)[:, None, None] + jnp.arange(Wo)[None, :, None]
              == jnp.arange(Wp)[None, None, :]).astype(jnp.float32)  # (K,Wo,Wp)
    band = jnp.einsum('awp,haij->hpiwj', onehot, w_hwio,
                      precision=jax.lax.Precision.HIGHEST)
    band = band.reshape(K, WCin, WC)
    band = jnp.pad(band, ((0, 0), (0, WCK - WCin), (0, 0))).astype(compute_dtype)

    # ---- pass 1: conv slab (lane dense, compute_dtype) + BN partials.
    kernel1 = functools.partial(_conv_stats_kernel, TH=TH, KH=K)
    y_slab, stats = pl.pallas_call(
        kernel1,
        grid=(N, nt),
        in_specs=[
            pl.BlockSpec((None, None, THp, WCK), lambda n, t: (n, t, 0, 0)),
            # Constant block index -> band is fetched once across the grid.
            # TODO(synk): add pipeline_mode=pl.Buffered(1) at production band
            # sizes to drop its double-buffer copy under v7x's 64 MiB VMEM.
            pl.BlockSpec((K, WCK, WC), lambda n, t: (0, 0, 0)),
        ],
        out_specs=[
            pl.BlockSpec((None, TH, WC), lambda n, t: (n, t, 0)),
            pl.BlockSpec((None, None, 8, WC), lambda n, t: (n, t, 0, 0)),
        ],
        out_shape=[
            jax.ShapeDtypeStruct((N, Ho, WC), compute_dtype),
            jax.ShapeDtypeStruct((N, nt, 8, WC), jnp.float32),
        ],
        scratch_shapes=[pltpu.VMEM((TH, WC), jnp.float32)],
        compiler_params=pltpu.CompilerParams(
            dimension_semantics=("parallel", "parallel"),
            vmem_limit_bytes=vmem_budget),
    )(xp_t, band)

    # ---- global BN stats (batch mean / biased var over N,H,W), f32, reduced
    # across all tiles so tiling does not change BatchNorm semantics.
    cnt = float(N * Ho * Wo)
    s1 = jnp.sum(stats[:, :, 0, :], axis=(0, 1)).reshape(Wo, Cout).sum(axis=0)
    s2 = jnp.sum(stats[:, :, 1, :], axis=(0, 1)).reshape(Wo, Cout).sum(axis=0)
    mean = s1 / cnt
    var = jnp.maximum(s2 / cnt - mean * mean, 0.0)    # clamp E[x^2]-E[x]^2 >= 0
    scale = gamma.astype(jnp.float32) * jax.lax.rsqrt(var + eps)
    shift = beta.astype(jnp.float32) - mean * scale
    s_row = jnp.tile(scale, Wo).reshape(1, WC)        # (wo, co) lane layout
    b_row = jnp.tile(shift, Wo).reshape(1, WC)
    # TODO(synk): BatchNorm2d running_mean/running_var buffer updates are not
    # produced (only the training-mode normalized activation is returned).

    # ---- pass 2: fused scale/shift + ReLU over big flattened row tiles.
    NR = N * Ho
    TR = _pick_row_tile(NR, 512)
    y_flat = y_slab.reshape(NR, WC)
    out_dtype = x_nchw.dtype
    alias = ({0: 0}
             if jnp.result_type(compute_dtype) == jnp.result_type(out_dtype)
             else {})
    out_flat = pl.pallas_call(
        _norm_act_kernel,
        grid=(NR // TR,),
        in_specs=[
            pl.BlockSpec((TR, WC), lambda r: (r, 0)),
            pl.BlockSpec((1, WC), lambda r: (0, 0)),
            pl.BlockSpec((1, WC), lambda r: (0, 0)),
        ],
        out_specs=pl.BlockSpec((TR, WC), lambda r: (r, 0)),
        out_shape=jax.ShapeDtypeStruct((NR, WC), out_dtype),
        input_output_aliases=alias,
        compiler_params=pltpu.CompilerParams(
            dimension_semantics=("parallel",),
            vmem_limit_bytes=vmem_budget),
    )(y_flat, s_row, b_row)

    # skip=False (default) -> no residual add; drop_path is Identity.
    out_nhwc = out_flat.reshape(N, Ho, Wo, Cout)
    return jnp.transpose(out_nhwc, (0, 3, 1, 2))      # back to NCHW


def reference(x_nchw, weight_oihw, gamma, beta, kernel_size, stride=1, eps=1e-6):
    pad = math.ceil((kernel_size - stride) / 2)
    y = jax.lax.conv_general_dilated(
        x_nchw, weight_oihw, window_strides=(stride, stride),
        padding=[(pad, pad), (pad, pad)],
        dimension_numbers=("NCHW", "OIHW", "NCHW"))
    mean = jnp.mean(y, axis=(0, 2, 3), keepdims=True)
    var = jnp.mean((y - mean) ** 2, axis=(0, 2, 3), keepdims=True)
    y = (y - mean) / jnp.sqrt(var + eps)
    y = y * gamma.reshape(1, -1, 1, 1) + beta.reshape(1, -1, 1, 1)
    return jnp.maximum(y, 0.0)


if __name__ == "__main__":
    key = jax.random.PRNGKey(0)
    k_x, k_w = jax.random.split(key)

    # ConvNormAct(dim_in=4, dim_out=8, kernel_size=3) -> padding=1
    N, Cin, H, W = 2, 4, 16, 16
    Cout, K = 8, 3

    x = jax.random.normal(k_x, (N, Cin, H, W), dtype=jnp.float32)
    weight = 0.1 * jax.random.normal(k_w, (Cout, Cin, K, K), dtype=jnp.float32)
    gamma = 1.0 + 0.1 * jnp.arange(Cout, dtype=jnp.float32)
    beta = 0.05 * jnp.arange(Cout, dtype=jnp.float32)

    ref = reference(x, weight, gamma, beta, K)

    # f32 MXU feed: tight check against the XLA reference.
    fwd_f32 = jax.jit(functools.partial(conv_norm_act, kernel_size=K,
                                        compute_dtype=jnp.float32))
    out = jax.block_until_ready(fwd_f32(x, weight, gamma, beta))
    assert out.shape == (N, Cout, H, W)
    assert jnp.allclose(out, ref, atol=1e-4, rtol=1e-4), "f32 mismatch vs reference"

    # bf16 MXU feed + bf16 intermediate slab (fast path per perf review).
    fwd_bf16 = jax.jit(functools.partial(conv_norm_act, kernel_size=K,
                                         compute_dtype=jnp.bfloat16))
    out_bf = jax.block_until_ready(fwd_bf16(x, weight, gamma, beta))
    assert out_bf.shape == (N, Cout, H, W)
    assert float(jnp.max(jnp.abs(out_bf - ref))) < 0.25, "bf16 mismatch vs reference"

    print("KERNEL_OK")
</pallas_src>

<mosaic_0001>
module attributes {stable_mosaic.version = 11 : i64} {
  func.func @_conv_stats_kernel(%arg0: i32, %arg1: i32, %arg2: memref<1x1x18x128xf32, #tpu.memory_space<vmem>>, %arg3: memref<3x128x128xf32, #tpu.memory_space<vmem>>, %arg4: memref<1x16x128xf32, #tpu.memory_space<vmem>>, %arg5: memref<1x1x8x128xf32, #tpu.memory_space<vmem>>, %arg6: memref<16x128xf32, #tpu.memory_space<vmem>>) attributes {dimension_semantics = [#tpu.dimension_semantics<parallel>, #tpu.dimension_semantics<parallel>], iteration_bounds = array<i64: 2, 1>, scalar_prefetch = 0 : i64, scratch_operands = 1 : i64, tpu.core_type = #tpu.core_type<tc>, window_params = [{transform_indices = @transform_0, window_bounds = array<i64: 1, 1, 18, 128>}, {pipeline_mode = #tpu.pipeline_mode<synchronous>, transform_indices = @transform_1, window_bounds = array<i64: 3, 128, 128>}, {transform_indices = @transform_2, window_bounds = array<i64: 1, 16, 128>}, {transform_indices = @transform_3, window_bounds = array<i64: 1, 1, 8, 128>}]} {
    %c0 = arith.constant 0 : index
    %c0_0 = arith.constant 0 : index
    %c0_1 = arith.constant 0 : index
    %c0_2 = arith.constant 0 : index
    %0 = vector.load %arg2[%c0, %c0_0, %c0_1, %c0_2] : memref<1x1x18x128xf32, #tpu.memory_space<vmem>>, vector<1x1x16x128xf32>
    %1 = vector.shape_cast %0 : vector<1x1x16x128xf32> to vector<16x128xf32>
    %c0_3 = arith.constant 0 : index
    %c0_4 = arith.constant 0 : index
    %c0_5 = arith.constant 0 : index
    %2 = vector.load %arg3[%c0_3, %c0_4, %c0_5] : memref<3x128x128xf32, #tpu.memory_space<vmem>>, vector<1x128x128xf32>
    %3 = vector.shape_cast %2 : vector<1x128x128xf32> to vector<128x128xf32>
    %cst = arith.constant dense<0.000000e+00> : vector<16x128xf32>
    %4 = tpu.matmul %1, %3, %cst {dimension_numbers = #tpu.dot_dimension_numbers<[1], [0], [0], [1], [0, 0, 1, 1], [], []>} : vector<16x128xf32>, vector<128x128xf32>, vector<16x128xf32> -> vector<16x128xf32>
    %c0_6 = arith.constant 0 : index
    %c0_7 = arith.constant 0 : index
    %5 = vector.load %arg6[%c0_6, %c0_7] : memref<16x128xf32, #tpu.memory_space<vmem>>, vector<16x128xf32>
    tpu.vector_store %arg6[%c0_6, %c0_7], %4 {strides = array<i32>} : memref<16x128xf32, #tpu.memory_space<vmem>>, vector<16x128xf32>,
    %c0_8 = arith.constant 0 : index
    %c0_9 = arith.constant 0 : index
    %6 = vector.load %arg6[%c0_8, %c0_9] : memref<16x128xf32, #tpu.memory_space<vmem>>, vector<16x128xf32>
    %c0_10 = arith.constant 0 : index
    %c0_11 = arith.constant 0 : index
    %c1 = arith.constant 1 : index
    %c0_12 = arith.constant 0 : index
    %7 = vector.load %arg2[%c0_10, %c0_11, %c1, %c0_12] : memref<1x1x18x128xf32, #tpu.memory_space<vmem>>, vector<1x1x16x128xf32>
    %8 = vector.shape_cast %7 : vector<1x1x16x128xf32> to vector<16x128xf32>
    %c1_13 = arith.constant 1 : index
    %c0_14 = arith.constant 0 : index
    %c0_15 = arith.constant 0 : index
    %9 = vector.load %arg3[%c1_13, %c0_14, %c0_15] : memref<3x128x128xf32, #tpu.memory_space<vmem>>, vector<1x128x128xf32>
    %10 = vector.shape_cast %9 : vector<1x128x128xf32> to vector<128x128xf32>
    %cst_16 = arith.constant dense<0.000000e+00> : vector<16x128xf32>
    %11 = tpu.matmul %8, %10, %cst_16 {dimension_numbers = #tpu.dot_dimension_numbers<[1], [0], [0], [1], [0, 0, 1, 1], [], []>} : vector<16x128xf32>, vector<128x128xf32>, vector<16x128xf32> -> vector<16x128xf32>
    %12 = arith.addf %6, %11 : vector<16x128xf32>
    %c0_17 = arith.constant 0 : index
    %c0_18 = arith.constant 0 : index
    %13 = vector.load %arg6[%c0_17, %c0_18] : memref<16x128xf32, #tpu.memory_space<vmem>>, vector<16x128xf32>
    tpu.vector_store %arg6[%c0_17, %c0_18], %12 {strides = array<i32>} : memref<16x128xf32, #tpu.memory_space<vmem>>, vector<16x128xf32>,
    %c0_19 = arith.constant 0 : index
    %c0_20 = arith.constant 0 : index
    %14 = vector.load %arg6[%c0_19, %c0_20] : memref<16x128xf32, #tpu.memory_space<vmem>>, vector<16x128xf32>
    %c0_21 = arith.constant 0 : index
    %c0_22 = arith.constant 0 : index
    %c2 = arith.constant 2 : index
    %c0_23 = arith.constant 0 : index
    %15 = vector.load %arg2[%c0_21, %c0_22, %c2, %c0_23] : memref<1x1x18x128xf32, #tpu.memory_space<vmem>>, vector<1x1x16x128xf32>
    %16 = vector.shape_cast %15 : vector<1x1x16x128xf32> to vector<16x128xf32>
    %c2_24 = arith.constant 2 : index
    %c0_25 = arith.constant 0 : index
    %c0_26 = arith.constant 0 : index
    %17 = vector.load %arg3[%c2_24, %c0_25, %c0_26] : memref<3x128x128xf32, #tpu.memory_space<vmem>>, vector<1x128x128xf32>
    %18 = vector.shape_cast %17 : vector<1x128x128xf32> to vector<128x128xf32>
    %cst_27 = arith.constant dense<0.000000e+00> : vector<16x128xf32>
    %19 = tpu.matmul %16, %18, %cst_27 {dimension_numbers = #tpu.dot_dimension_numbers<[1], [0], [0], [1], [0, 0, 1, 1], [], []>} : vector<16x128xf32>, vector<128x128xf32>, vector<16x128xf32> -> vector<16x128xf32>
    %20 = arith.addf %14, %19 : vector<16x128xf32>
    %c0_28 = arith.constant 0 : index
    %c0_29 = arith.constant 0 : index
    %21 = vector.load %arg6[%c0_28, %c0_29] : memref<16x128xf32, #tpu.memory_space<vmem>>, vector<16x128xf32>
    tpu.vector_store %arg6[%c0_28, %c0_29], %20 {strides = array<i32>} : memref<16x128xf32, #tpu.memory_space<vmem>>, vector<16x128xf32>,
    %c0_30 = arith.constant 0 : index
    %c0_31 = arith.constant 0 : index
    %22 = vector.load %arg6[%c0_30, %c0_31] : memref<16x128xf32, #tpu.memory_space<vmem>>, vector<16x128xf32>
    %c0_32 = arith.constant 0 : index
    %c0_33 = arith.constant 0 : index
    %c0_34 = arith.constant 0 : index
    %23 = vector.load %arg4[%c0_32, %c0_33, %c0_34] : memref<1x16x128xf32, #tpu.memory_space<vmem>>, vector<1x16x128xf32>
    %24 = vector.shape_cast %23 : vector<1x16x128xf32> to vector<16x128xf32>
    %25 = vector.shape_cast %22 : vector<16x128xf32> to vector<1x16x128xf32>
    tpu.vector_store %arg4[%c0_32, %c0_33, %c0_34], %25 {strides = array<i32>} : memref<1x16x128xf32, #tpu.memory_space<vmem>>, vector<1x16x128xf32>,
    %cst_35 = arith.constant dense<0.000000e+00> : vector<128xf32>
    %26 = vector.multi_reduction <add>, %22, %cst_35 [0] : vector<16x128xf32> to vector<128xf32>
    %27 = vector.shape_cast %26 : vector<128xf32> to vector<1x128xf32>
    %28 = arith.mulf %22, %22 : vector<16x128xf32>
    %cst_36 = arith.constant dense<0.000000e+00> : vector<128xf32>
    %29 = vector.multi_reduction <add>, %28, %cst_36 [0] : vector<16x128xf32> to vector<128xf32>
    %30 = vector.shape_cast %29 : vector<128xf32> to vector<1x128xf32>
    %31 = tpu.iota {dimensions = array<i32: 0>} : vector<8x128xi32>
    %c0_i32 = arith.constant 0 : i32
    %32 = vector.broadcast %c0_i32 : i32 to vector<8x128xi32>
    %33 = arith.cmpi eq, %31, %32 : vector<8x128xi32>
    %c1_i32 = arith.constant 1 : i32
    %34 = vector.broadcast %c1_i32 : i32 to vector<8x128xi32>
    %35 = arith.cmpi eq, %31, %34 : vector<8x128xi32>
    %cst_37 = arith.constant 0.000000e+00 : f32
    %36 = vector.shape_cast %30 : vector<1x128xf32> to vector<1x128xf32>
    %37 = vector.broadcast %36 : vector<1x128xf32> to vector<8x128xf32>
    %38 = vector.broadcast %cst_37 : f32 to vector<8x128xf32>
    %39 = arith.select %35, %37, %38 : vector<8x128xi1>, vector<8x128xf32>
    %40 = vector.shape_cast %27 : vector<1x128xf32> to vector<1x128xf32>
    %41 = vector.broadcast %40 : vector<1x128xf32> to vector<8x128xf32>
    %42 = arith.select %33, %41, %39 : vector<8x128xi1>, vector<8x128xf32>
    %c0_38 = arith.constant 0 : index
    %c0_39 = arith.constant 0 : index
    %c0_40 = arith.constant 0 : index
    %c0_41 = arith.constant 0 : index
    %43 = vector.load %arg5[%c0_38, %c0_39, %c0_40, %c0_41] : memref<1x1x8x128xf32, #tpu.memory_space<vmem>>, vector<1x1x8x128xf32>
    %44 = vector.shape_cast %43 : vector<1x1x8x128xf32> to vector<8x128xf32>
    %45 = vector.shape_cast %42 : vector<8x128xf32> to vector<1x1x8x128xf32>
    tpu.vector_store %arg5[%c0_38, %c0_39, %c0_40, %c0_41], %45 {strides = array<i32>} : memref<1x1x8x128xf32, #tpu.memory_space<vmem>>, vector<1x1x8x128xf32>,
    return
  }
  func.func @transform_0(%arg0: i32, %arg1: i32) -> (i32, i32, i32, i32) {
    %c0_i32 = arith.constant 0 : i32
    %c0_i32_0 = arith.constant 0 : i32
    %c0_i32_1 = arith.constant 0 : i32
    return %arg0, %arg1, %c0_i32, %c0_i32_0 : i32, i32, i32, i32
  }
  func.func @transform_1(%arg0: i32, %arg1: i32) -> (i32, i32, i32) {
    %c0_i32 = arith.constant 0 : i32
    %c0_i32_0 = arith.constant 0 : i32
    %c0_i32_1 = arith.constant 0 : i32
    %c0_i32_2 = arith.constant 0 : i32
    return %c0_i32, %c0_i32_0, %c0_i32_1 : i32, i32, i32
  }
  func.func @transform_2(%arg0: i32, %arg1: i32) -> (i32, i32, i32) {
    %c0_i32 = arith.constant 0 : i32
    %c0_i32_0 = arith.constant 0 : i32
    return %arg0, %arg1, %c0_i32 : i32, i32, i32
  }
  func.func @transform_3(%arg0: i32, %arg1: i32) -> (i32, i32, i32, i32) {
    %c0_i32 = arith.constant 0 : i32
    %c0_i32_0 = arith.constant 0 : i32
    %c0_i32_1 = arith.constant 0 : i32
    return %arg0, %arg1, %c0_i32, %c0_i32_0 : i32, i32, i32, i32
  }
}

module attributes {stable_mosaic.version = 11 : i64} {
  func.func @_norm_act_kernel(%arg0: i32, %arg1: memref<32x128xf32, #tpu.memory_space<vmem>>, %arg2: memref<1x128xf32, #tpu.memory_space<vmem>>, %arg3: memref<1x128xf32, #tpu.memory_space<vmem>>, %arg4: memref<32x128xf32, #tpu.memory_space<vmem>>) attributes {dimension_semantics = [#tpu.dimension_semantics<parallel>], iteration_bounds = array<i64: 1>, scalar_prefetch = 0 : i64, scratch_operands = 0 : i64, tpu.core_type = #tpu.core_type<tc>, window_params = [{transform_indices = @transform_0, window_bounds = array<i64: 32, 128>}, {pipeline_mode = #tpu.pipeline_mode<synchronous>, transform_indices = @transform_1, window_bounds = array<i64: 1, 128>}, {pipeline_mode = #tpu.pipeline_mode<synchronous>, transform_indices = @transform_2, window_bounds = array<i64: 1, 128>}, {transform_indices = @transform_3, window_bounds = array<i64: 32, 128>}]} {
    %c0 = arith.constant 0 : index
    %c0_0 = arith.constant 0 : index
    %0 = vector.load %arg1[%c0, %c0_0] : memref<32x128xf32, #tpu.memory_space<vmem>>, vector<32x128xf32>
    %c0_1 = arith.constant 0 : index
    %c0_2 = arith.constant 0 : index
    %1 = vector.load %arg2[%c0_1, %c0_2] : memref<1x128xf32, #tpu.memory_space<vmem>>, vector<1x128xf32>
    %2 = vector.broadcast %1 : vector<1x128xf32> to vector<32x128xf32>
    %3 = arith.mulf %0, %2 : vector<32x128xf32>
    %c0_3 = arith.constant 0 : index
    %c0_4 = arith.constant 0 : index
    %4 = vector.load %arg3[%c0_3, %c0_4] : memref<1x128xf32, #tpu.memory_space<vmem>>, vector<1x128xf32>
    %5 = vector.broadcast %4 : vector<1x128xf32> to vector<32x128xf32>
    %6 = arith.addf %3, %5 : vector<32x128xf32>
    %cst = arith.constant 0.000000e+00 : f32
    %7 = vector.broadcast %cst : f32 to vector<32x128xf32>
    %8 = arith.maximumf %6, %7 : vector<32x128xf32>
    %c0_5 = arith.constant 0 : index
    %c0_6 = arith.constant 0 : index
    %9 = vector.load %arg4[%c0_5, %c0_6] : memref<32x128xf32, #tpu.memory_space<vmem>>, vector<32x128xf32>
    tpu.vector_store %arg4[%c0_5, %c0_6], %8 {strides = array<i32>} : memref<32x128xf32, #tpu.memory_space<vmem>>, vector<32x128xf32>,
    return
  }
  func.func @transform_0(%arg0: i32) -> (i32, i32) {
    %c0_i32 = arith.constant 0 : i32
    %c0_i32_0 = arith.constant 0 : i32
    return %arg0, %c0_i32 : i32, i32
  }
  func.func @transform_1(%arg0: i32) -> (i32, i32) {
    %c0_i32 = arith.constant 0 : i32
    %c0_i32_0 = arith.constant 0 : i32
    %c0_i32_1 = arith.constant 0 : i32
    return %c0_i32, %c0_i32_0 : i32, i32
  }
  func.func @transform_2(%arg0: i32) -> (i32, i32) {
    %c0_i32 = arith.constant 0 : i32
    %c0_i32_0 = arith.constant 0 : i32
    %c0_i32_1 = arith.constant 0 : i32
    return %c0_i32, %c0_i32_0 : i32, i32
  }
  func.func @transform_3(%arg0: i32) -> (i32, i32) {
    %c0_i32 = arith.constant 0 : i32
    %c0_i32_0 = arith.constant 0 : i32
    return %arg0, %c0_i32 : i32, i32
  }
}

</mosaic_0001>

<bundles_post_ra>
// kernel: conv_norm_act.2
= control target key start
LH: loop header
LB: loop body
LE: loop exit
PB: predicated region body
PF: predicated region fallthrough
CT: control target
= control target key end

     0   :  { %s1052_s12 = smov 0   ;;  %s1054_s13 = smov 0   ;;  %s1245_s0 = inlined_call_operand.vmem [shape: f32[2,1,18,128], index: 0, kind: input, shape index: {}]   ;;  %s1246_s1 = inlined_call_operand.vmem [shape: f32[3,128,128], index: 1, kind: input, shape index: {}]   ;;  %s1247_s2 = inlined_call_operand.vmem [shape: f32[2,16,128], index: 2, kind: output, shape index: {0}]   ;;  %s1248_s3 = inlined_call_operand.vmem [shape: f32[2,1,8,128], index: 3, kind: output, shape index: {1}]  }
   0x1   :  { %s1056_s14 = smov 0  }
   0x2 LB: > { %s26_s15 = sadd.s32 1, %s1026_s13  ;;  %p684_p0 = scmp.ge.s32.totalorder %s1030_s14, 1  ;;  %s1030_s14 = sphi %s1056_s14, %s14_s14   ;;  %s1026_s13 = sphi %s1054_s13, %s1250_s13   ;;  %s1022_s12 = sphi %s1052_s12, %s1249_s12  }
   0x3   : > { %p28_p1 = scmp.ge.s32.totalorder %s26_s15, 2  ;;  %p162_p2 = scmp.lt.s32.totalorder %s1030_s14, 3 }
   0x5   : > { %s1252_s15 = smov (%p28_p1, %s26_s15), 0  ;;  %p163_p3 = pnand %p684_p0, %p162_p2 }
   0x6   : > { %v689_v0 = vld [vmem:[%s1246_s1 + $0x80] sm:$0xff] (!%p163_p3)  ;;  %v690_v1 = vld [vmem:[%s1246_s1 + $0x88] sm:$0xff] (!%p163_p3)  ;;  %v691_v2 = vld [vmem:[%s1246_s1 + $0x90] sm:$0xff] (!%p163_p3)  ;;  %p201_p4 = scmp.lt.s32.totalorder (!%p163_p3), %s1022_s12, 1 }
   0x7   : > { %166 = sbr.rel (%p163_p3) target bundleno = 307 (0x133), region = 28  ;;  %v915_v3 = vpack.c.bf16 (!%p163_p3), %v690_v1, %v689_v0  ;;  %v692_v4 = vld [vmem:[%s1246_s1 + $0x98] sm:$0xff] (!%p163_p3)  ;;  %v693_v6 = vld [vmem:[%s1246_s1 + $0xa0] sm:$0xff] (!%p163_p3)  ;;  %v694_v7 = vld [vmem:[%s1246_s1 + $0xa8] sm:$0xff] (!%p163_p3) }
   0x8   : > { %v919_v5 = vpack.c.bf16 (!%p163_p3), %v692_v4, %v691_v2  ;;  %v923_v8 = vpack.c.bf16 (!%p163_p3), %v694_v7, %v693_v6  ;;  %v229_v9 = vld [vmem:[%s1246_s1] sm:$0xff] (!%p163_p3)  ;;  %v230_v10 = vld [vmem:[%s1246_s1 + $0x8] sm:$0xff] (!%p163_p3)  ;;  %v695_v11 = vld [vmem:[%s1246_s1 + $0xb0] sm:$0xff] (!%p163_p3) }
   0x9   : > { %916 = vmatprep.subr.bf16.mxu0 (!%p163_p3), %v915_v3  ;;  %v696_v12 = vld [vmem:[%s1246_s1 + $0xb8] sm:$0xff] (!%p163_p3)  ;;  %v883_v13 = vpack.c.bf16 (!%p163_p3), %v230_v10, %v229_v9  ;;  %v231_v14 = vld [vmem:[%s1246_s1 + $0x10] sm:$0xff] (!%p163_p3)  ;;  %v233_v18 = vld [vmem:[%s1246_s1 + $0x20] sm:$0xff] (!%p163_p3) }
   0xa   : > { %918 = vmatpush3.bf16.msra.mxu0 (!%p163_p3), %v915_v3  ;;  %v232_v16 = vld [vmem:[%s1246_s1 + $0x18] sm:$0xff] (!%p163_p3)  ;;  %v927_v19 = vpack.c.bf16 (!%p163_p3), %v696_v12, %v695_v11  ;;  %v234_v20 = vld [vmem:[%s1246_s1 + $0x28] sm:$0xff] (!%p163_p3)  ;;  %v697_v21 = vld [vmem:[%s1246_s1 + $0xc0] sm:$0xff] (!%p163_p3) }
   0xb   : > { %920 = vmatprep.subr.bf16.mxu0 (!%p163_p3), %v919_v5  ;;  %884 = vmatprep.subr.bf16.mxu1 (!%p163_p3), %v883_v13  ;;  %v887_v17 = vpack.c.bf16 (!%p163_p3), %v232_v16, %v231_v14  ;;  %v698_v22 = vld [vmem:[%s1246_s1 + $0xc8] sm:$0xff] (!%p163_p3)  ;;  %v891_v23 = vpack.c.bf16 (!%p163_p3), %v234_v20, %v233_v18  ;;  %v235_v24 = vld [vmem:[%s1246_s1 + $0x30] sm:$0xff] (!%p163_p3)  ;;  %v236_v25 = vld [vmem:[%s1246_s1 + $0x38] sm:$0xff] (!%p163_p3) }
   0xc   : > { %886 = vmatpush3.bf16.msra.mxu1 (!%p163_p3), %v883_v13  ;;  %v931_v26 = vpack.c.bf16 (!%p163_p3), %v698_v22, %v697_v21  ;;  %v699_v27 = vld [vmem:[%s1246_s1 + $0xd0] sm:$0xff] (!%p163_p3)  ;;  %v700_v28 = vld [vmem:[%s1246_s1 + $0xd8] sm:$0xff] (!%p163_p3)  ;;  %v895_v29 = vpack.c.bf16 (!%p163_p3), %v236_v25, %v235_v24  ;;  %v237_v30 = vld [vmem:[%s1246_s1 + $0x40] sm:$0xff] (!%p163_p3) }
   0xd   : > { %888 = vmatprep.subr.bf16.mxu1 (!%p163_p3), %v887_v17  ;;  %v238_v31 = vld [vmem:[%s1246_s1 + $0x48] sm:$0xff] (!%p163_p3)  ;;  %v935_v33 = vpack.c.bf16 (!%p163_p3), %v700_v28, %v699_v27  ;;  %v701_v34 = vld [vmem:[%s1246_s1 + $0xe0] sm:$0xff] (!%p163_p3)  ;;  %v239_v37 = vld [vmem:[%s1246_s1 + $0x50] sm:$0xff] (!%p163_p3)  ;;  %v542_v27 = vlaneseq (!%p163_p3) }
   0xe   : > { %s1254_s12 = smov (!%p201_p4, %s1022_s12), 1  ;;  %922 = vmatpush3.bf16.msra.mxu0 %v919_v5  ;;  %v702_v35 = vld [vmem:[%s1246_s1 + $0xe8] sm:$0xff]  ;;  %v899_v36 = vpack.c.bf16 %v238_v31, %v237_v30  ;;  %v240_v38 = vld [vmem:[%s1246_s1 + $0x58] sm:$0xff]  ;;  %v703_v40 = vld [vmem:[%s1246_s1 + $0xf0] sm:$0xff] }
   0xf   : > { %s983_s28 = smul.u32 24, %s1254_s12  ;;  %924 = vmatprep.subr.bf16.mxu0 %v923_v8  ;;  %v939_v39 = vpack.c.bf16 %v702_v35, %v701_v34  ;;  %v704_v41 = vld [vmem:[%s1246_s1 + $0xf8] sm:$0xff]  ;;  %v903_v42 = vpack.c.bf16 %v240_v38, %v239_v37  ;;  %v241_v43 = vld [vmem:[%s1246_s1 + $0x60] sm:$0xff]  ;;  %v242_v44 = vld [vmem:[%s1246_s1 + $0x68] sm:$0xff]  ;;  %s723_s27 = sshll.u32 %s1254_s12, 4 }
  0x10   : > { %890 = vmatpush3.bf16.msra.mxu1 %v887_v17  ;;  %v943_v45 = vpack.c.bf16 %v704_v41, %v703_v40  ;;  %v705_v46 = vld [vmem:[%s1246_s1 + $0x100] sm:$0xff]  ;;  %v706_v47 = vld [vmem:[%s1246_s1 + $0x108] sm:$0xff]  ;;  %v907_v48 = vpack.c.bf16 %v242_v44, %v241_v43  ;;  %v243_v49 = vld [vmem:[%s1246_s1 + $0x70] sm:$0xff]  ;;  %s218_s30 = scalar_lea.vmem %s1247_s2, %s723_s27 }
  0x11   : > { %s1106_s16 = scalar_lea.vmem %s1245_s0, %s983_s28  ;;  %892 = vmatprep.subr.bf16.mxu1 %v891_v23  ;;  %v244_v50 = vld [vmem:[%s1246_s1 + $0x78] sm:$0xff]  ;;  %v947_v51 = vpack.c.bf16 %v706_v47, %v705_v46  ;;  %v707_v52 = vld [vmem:[%s1246_s1 + $0x110] sm:$0xff]  ;;  %v709_v58 = vld [vmem:[%s1246_s1 + $0x120] sm:$0xff] }
  0x12   : > { %v324_v15 = vld [vmem:[%s1106_s16 + $0x1] sm:$0xff]  ;;  %926 = vmatpush3.bf16.msra.mxu0 %v923_v8  ;;  %v708_v53 = vld [vmem:[%s1246_s1 + $0x118] sm:$0xff]  ;;  %v911_v54 = vpack.c.bf16 %v244_v50, %v243_v49  ;;  %v325_v55 = vld [vmem:[%s1106_s16 + $0x9] sm:$0xff] }
  0x13   : > { %845 = vmatprep.mubr.f32.mxu0 %v324_v15  ;;  %928 = vmatprep.subr.bf16.mxu0 %v927_v19  ;;  %v227_v32 = vld [vmem:[%s1106_s16] sm:$0xff]  ;;  %v951_v56 = vpack.c.bf16 %v708_v53, %v707_v52  ;;  %v710_v59 = vld [vmem:[%s1246_s1 + $0x128] sm:$0xff]  ;;  %v711_v62 = vld [vmem:[%s1246_s1 + $0x130] sm:$0xff] }
  0x14   : > { %894 = vmatpush3.bf16.msra.mxu1 %v891_v23  ;;  %810 = vmatprep.mubr.f32.mxu1 %v227_v32  ;;  %v424_v57 = vld [vmem:[%s1106_s16 + $0x2] sm:$0xff]  ;;  %v955_v60 = vpack.c.bf16 %v710_v59, %v709_v58  ;;  %v712_v63 = vld [vmem:[%s1246_s1 + $0x138] sm:$0xff]  ;;  %v715_v4 = vld [vmem:[%s1246_s1 + $0x150] sm:$0xff]  ;;  %v543_v32 = vshrl.u32 %v542_v27, 7 }
  0x15   : > { %896 = vmatprep.subr.bf16.mxu1 %v895_v29  ;;  %v228_v61 = vld [vmem:[%s1106_s16 + $0x8] sm:$0xff]  ;;  %v959_v0 = vpack.c.bf16 %v712_v63, %v711_v62  ;;  %v713_v1 = vld [vmem:[%s1246_s1 + $0x140] sm:$0xff]  ;;  %v716_v5 = vld [vmem:[%s1246_s1 + $0x158] sm:$0xff] }
  0x16   : > { %930 = vmatpush3.bf16.msra.mxu0 %v927_v19  ;;  %v714_v2 = vld [vmem:[%s1246_s1 + $0x148] sm:$0xff]  ;;  %v967_v6 = vpack.c.bf16 %v716_v5, %v715_v4  ;;  %v717_v7 = vld [vmem:[%s1246_s1 + $0x160] sm:$0xff]  ;;  %v719_v10 = vld [vmem:[%s1246_s1 + $0x170] sm:$0xff]  ;;  %vm545_vm0 = vcmp.eq.s32.totalorder %v543_v32, 1  ;;  %vm544_vm1 = vcmp.eq.s32.totalorder %v543_v32, 0 }
  0x17   : > { %932 = vmatprep.subr.bf16.mxu0 %v931_v26  ;;  %v963_v3 = vpack.c.bf16 %v714_v2, %v713_v1  ;;  %v718_v8 = vld [vmem:[%s1246_s1 + $0x168] sm:$0xff]  ;;  %v720_v11 = vld [vmem:[%s1246_s1 + $0x178] sm:$0xff] }
  0x18   : > { %898 = vmatpush3.bf16.msra.mxu1 %v895_v29  ;;  %v971_v9 = vpack.c.bf16 %v718_v8, %v717_v7  ;;  %v975_v12 = vpack.c.bf16 %v720_v11, %v719_v10  ;;  %v425_v13 = vld [vmem:[%s1106_s16 + $0xa] sm:$0xff]  ;;  %s688_s16 = sshll.u32 %s1254_s12, 3 }
  0x19   : > { %900 = vmatprep.subr.bf16.mxu1 %v899_v36  ;;  %s226_s6 = scalar_lea.vmem %s1248_s3, %s688_s16 }
  0x1a   : > { %934 = vmatpush3.bf16.msra.mxu0 %v931_v26 }
  0x1b   : > { %936 = vmatprep.subr.bf16.mxu0 %v935_v33 }
  0x1c   : > { %902 = vmatpush3.bf16.msra.mxu1 %v899_v36 }
  0x1d   : > { %904 = vmatprep.subr.bf16.mxu1 %v903_v42 }
  0x1e   : > { %938 = vmatpush3.bf16.msra.mxu0 %v935_v33 }
  0x1f   : > { %940 = vmatprep.subr.bf16.mxu0 %v939_v39 }
  0x20   : > { %906 = vmatpush3.bf16.msra.mxu1 %v903_v42 }
  0x21   : > { %908 = vmatprep.subr.bf16.mxu1 %v907_v48 }
  0x22   : > { %942 = vmatpush3.bf16.msra.mxu0 %v939_v39 }
  0x23   : > { %944 = vmatprep.subr.bf16.mxu0 %v943_v45 }
  0x24   : > { %910 = vmatpush3.bf16.msra.mxu1 %v907_v48 }
  0x25   : > { %912 = vmatprep.subr.bf16.mxu1 %v911_v54 }
  0x26   : > { %946 = vmatpush3.bf16.msra.mxu0 %v943_v45 }
  0x27   : > { %948 = vmatprep.subr.bf16.mxu0 %v947_v51 }
  0x28   : > { %914 = vmatpush3.bf16.msra.mxu1 %v911_v54 }
  0x29   : > { %846 = vmatmul.mubr.f32.vlgmr.msra.gmra.mrb[0].mxu0 %v325_v55 }
  0x2a   : > { %950 = vmatpush3.bf16.msra.mxu0 %v947_v51  ;;  %880 = vmatprep.mubr.f32.mxu0 %v424_v57 }
  0x2b   : > { %952 = vmatprep.subr.bf16.mxu0 %v951_v56  ;;  %811 = vmatmul.mubr.f32.vlgmr.msra.gmra.mrb[0].mxu1 %v228_v61 }
  0x2e   : > { %954 = vmatpush3.bf16.msra.mxu0 %v951_v56 }
  0x2f   : > { %956 = vmatprep.subr.bf16.mxu0 %v955_v60 }
  0x32   : > { %958 = vmatpush3.bf16.msra.mxu0 %v955_v60 }
  0x33   : > { %960 = vmatprep.subr.bf16.mxu0 %v959_v0 }
  0x36   : > { %962 = vmatpush3.bf16.msra.mxu0 %v959_v0 }
  0x37   : > { %964 = vmatprep.subr.bf16.mxu0 %v963_v3 }
  0x3a   : > { %966 = vmatpush3.bf16.msra.mxu0 %v963_v3 }
  0x3b   : > { %968 = vmatprep.subr.bf16.mxu0 %v967_v6 }
  0x3e   : > { %970 = vmatpush3.bf16.msra.mxu0 %v967_v6 }
  0x3f   : > { %972 = vmatprep.subr.bf16.mxu0 %v971_v9 }
  0x42   : > { %974 = vmatpush3.bf16.msra.mxu0 %v971_v9 }
  0x43   : > { %976 = vmatprep.subr.bf16.mxu0 %v975_v12 }
  0x46   : > { %978 = vmatpush3.bf16.msra.mxu0 %v975_v12 }
  0x49   : > { %881 = vmatmul.mubr.f32.vlgmr.msra.gmra.mrb[0].mxu0 %v425_v13 }
  0xfe   : > { %v812_v14 = vpop.f32.mrb[0].mxu1 }
  0xff   : > { %v311_v15 = vpop.f32.mrb[1].mxu1 }
 0x11c   : > { %v882_v16 = vpop.f32.mrb[0].mxu0 }
 0x11d   : > { %v979_v17 = vadd.f32 %v882_v16, %v812_v14  ;;  %v509_v18 = vpop.f32.mrb[1].mxu0 }
 0x11e   : > { %v980_v19 = vadd.f32 %v509_v18, %v311_v15 }
 0x11f   : > { %525 = vst [vmem:[%s218_s30 + $0x8] sm:$0xff] %v979_v17  ;;  %v534_v20 = vmul.f32 %v979_v17, %v979_v17 }
 0x120   : > { %524 = vst [vmem:[%s218_s30] sm:$0xff] %v980_v19  ;;  %v526_v21 = vadd.f32 %v980_v19, %v979_v17  ;;  %v533_v22 = vmul.f32 %v980_v19, %v980_v19 }
 0x122   : > { %v527_v23 = vrot.slane %v526_v21, 4  ;;  %v535_v24 = vadd.f32 %v534_v20, %v533_v22 }
 0x124   : > { %v528_v25 = vadd.f32 %v527_v23, %v526_v21  ;;  %v536_v26 = vrot.slane %v535_v24, 4 }
 0x126   : > { %v529_v28 = vrot.slane %v528_v25, 2  ;;  %v537_v29 = vadd.f32 %v536_v26, %v535_v24 }
 0x128   : > { %v530_v30 = vadd.f32 %v529_v28, %v528_v25  ;;  %v538_v31 = vrot.slane %v537_v29, 2 }
 0x12a   : > { %v539_v33 = vadd.f32 %v538_v31, %v537_v29  ;;  %v531_v34 = vrot.slane %v530_v30, 1 }
 0x12c   : > { %v540_v35 = vrot.slane %v539_v33, 1  ;;  %v532_v37 = vadd.f32 %v531_v34, %v530_v30 }
 0x12e   : > { %v541_v36 = vadd.f32 %v540_v35, %v539_v33 }
 0x130   : > { %v546_v38 = vsel %vm545_vm0, %v541_v36, 0.0 }
 0x131   : > { %v547_v39 = vsel %vm544_vm1, %v532_v37, %v546_v38 }
 0x132   : > { %548 = vst [vmem:[%s226_s6] sm:$0xff] %v547_v39 }
 0x133 PF: > { %s14_s14 = sadd.s32 1, %s1030_s14   ;;  %s1249_s12 = smov %s1026_s13 }
 0x134   : > { %p11_p5 = scmp.ge.s32.totalorder %s14_s14, 4   ;;  %s1250_s13 = smov %s1252_s15 }
 0x136   :  { %13 = sbr.rel (!%p11_p5) target bundleno = 2 (0x2), region = 72 }

// kernel: tile.13
= control target key start
LH: loop header
LB: loop body
LE: loop exit
PB: predicated region body
PF: predicated region fallthrough
CT: control target
= control target key end

     0   :  { %s28_s0 = inlined_call_operand.vmem [shape: f32[8], index: 0, kind: input, shape index: {}]   ;;  %s29_s1 = inlined_call_operand.vmem [shape: f32[16,8], index: 1, kind: output, shape index: {}]  }
   0x1   :  { %v4_v0 = vld [vmem:[%s28_s0] ss:$0 sm:$0xff] }
   0x2   :  { %5 = vst [vmem:[%s29_s1] sm:$0xff] %v4_v0  ;;  %8 = vst [vmem:[%s29_s1 + $0x8] sm:$0xff] %v4_v0 }

// kernel: tile.14
= control target key start
LH: loop header
LB: loop body
LE: loop exit
PB: predicated region body
PF: predicated region fallthrough
CT: control target
= control target key end

     0   :  { %s131_s10 = smov 120   ;;  %s132_s11 = smov 104   ;;  %vm3_vm0 = vcmask 64512   ;;  %vm9_vm1 = vcmask 1048512   ;;  %vm15_vm2 = vcmask 982912   ;;  %vm21_vm3 = vcmask 917312   ;;  %s207_s0 = inlined_call_operand.vmem [shape: f32[16,8], index: 0, kind: input, shape index: {}]   ;;  %s208_s1 = inlined_call_operand.vmem [shape: f32[1,128], index: 1, kind: output, shape index: {}]  }
   0x1   :  { %v101_v0 = vld [vmem:[%s207_s0 + $0xf] sm:$0x1]   ;;  %v103_v1 = vld [vmem:[%s207_s0 + $0xd] sm:$0x1]   ;;  %v102_v2 = vld [vmem:[%s207_s0 + $0xe] sm:$0x1]  }
   0x2   :  { %7 = vrot.lane.b32.xlu0 %v101_v0, %s131_s10  ;;  %19 = vrot.lane.b32.xlu1 %v103_v1, %s132_s11  ;;  %v104_v3 = vld [vmem:[%s207_s0 + $0xc] sm:$0x1]   ;;  %s133_s16 = smov 112   ;;  %s134_s17 = smov 96   ;;  %v105_v4 = vld [vmem:[%s207_s0 + $0xb] sm:$0x1]  }
   0x3   :  { %v106_v5 = vld [vmem:[%s207_s0 + $0xa] sm:$0x1]   ;;  %v2_v6 = vld [vmem:[%s207_s0] sm:$0x1]   ;;  %s135_s24 = smov 88   ;;  %s136_s25 = smov 80  }
   0x4   :  { %4 = vst.msk [vmem:[#allocation0] sm:$0x1] %vm3_vm0, %v2_v6   ;;  %v107_v7 = vld [vmem:[%s207_s0 + $0x9] sm:$0x1]   ;;  %v108_v8 = vld [vmem:[%s207_s0 + $0x8] sm:$0x1]  }
   0x5   :  { %s137_s30 = smov 72   ;;  %s138_s2 = smov 64   ;;  %v109_v9 = vld [vmem:[%s207_s0 + $0x7] sm:$0x1]   ;;  %v110_v10 = vld [vmem:[%s207_s0 + $0x6] sm:$0x1]  }
   0x6   :  { %13 = vrot.lane.b32.xlu0 %v102_v2, %s133_s16  ;;  %25 = vrot.lane.b32.xlu1 %v104_v3, %s134_s17  ;;  %s139_s7 = smov 56   ;;  %s140_s8 = smov 48   ;;  %v111_v11 = vld [vmem:[%s207_s0 + $0x5] sm:$0x1]   ;;  %v112_v12 = vld [vmem:[%s207_s0 + $0x4] sm:$0x1]  }
   0x7   :  { %s141_s13 = smov 40   ;;  %s142_s14 = smov 32   ;;  %v113_v13 = vld [vmem:[%s207_s0 + $0x3] sm:$0x1]   ;;  %v114_v14 = vld [vmem:[%s207_s0 + $0x2] sm:$0x1]  }
   0x8   :  { %s143_s19 = smov 24   ;;  %s144_s20 = smov 16   ;;  %v115_v15 = vld [vmem:[%s207_s0 + $0x1] sm:$0x1]   ;;  %vm27_vm4 = vcmask 851712   ;;  %vm33_vm5 = vcmask 786112  }
   0x9   :  { %s145_s0 = smov 8   ;;  %vm39_vm6 = vcmask 720512   ;;  %vm45_vm7 = vcmask 654912   ;;  %vm51_vm8 = vcmask 589312   ;;  %vm57_vm9 = vcmask 523712  }
   0xa   :  { %31 = vrot.lane.b32.xlu0 %v105_v4, %s135_s24  ;;  %37 = vrot.lane.b32.xlu1 %v106_v5, %s136_s25  ;;  %vm63_vm10 = vcmask 458112   ;;  %vm69_vm11 = vcmask 392512   ;;  %vm75_vm12 = vcmask 326912   ;;  %vm81_vm13 = vcmask 261312  }
   0xb   :  { %vm87_vm14 = vcmask 195712   ;;  %vm93_vm15 = vcmask 130112  }
   0xe   :  { %43 = vrot.lane.b32.xlu0 %v107_v7, %s137_s30  ;;  %49 = vrot.lane.b32.xlu1 %v108_v8, %s138_s2 }
  0x12   :  { %55 = vrot.lane.b32.xlu0 %v109_v9, %s139_s7  ;;  %61 = vrot.lane.b32.xlu1 %v110_v10, %s140_s8 }
  0x16   :  { %67 = vrot.lane.b32.xlu0 %v111_v11, %s141_s13  ;;  %73 = vrot.lane.b32.xlu1 %v112_v12, %s142_s14 }
  0x1a   :  { %79 = vrot.lane.b32.xlu0 %v113_v13, %s143_s19  ;;  %85 = vrot.lane.b32.xlu1 %v114_v14, %s144_s20 }
  0x1e   :  { %91 = vrot.lane.b32.xlu0 %v115_v15, %s145_s0 }
  0x74   :  { %v8_v16 = vpop.permute.xlu0 %7   ;;  %v20_v17 = vpop.permute.xlu1 %19  }
  0x75   :  { %10 = vst.msk [vmem:[#allocation0] sm:$0x1] %vm9_vm1, %v8_v16  }
  0x78   :  { %v14_v18 = vpop.permute.xlu0 %13   ;;  %v26_v19 = vpop.permute.xlu1 %25  }
  0x79   :  { %16 = vst.msk [vmem:[#allocation0] sm:$0x1] %vm15_vm2, %v14_v18  }
  0x7a   :  { %22 = vst.msk [vmem:[#allocation0] sm:$0x1] %vm21_vm3, %v20_v17  }
  0x7b   :  { %28 = vst.msk [vmem:[#allocation0] sm:$0x1] %vm27_vm4, %v26_v19  }
  0x7c   :  { %v32_v20 = vpop.permute.xlu0 %31   ;;  %v38_v21 = vpop.permute.xlu1 %37  }
  0x7d   :  { %34 = vst.msk [vmem:[#allocation0] sm:$0x1] %vm33_vm5, %v32_v20  }
  0x7e   :  { %40 = vst.msk [vmem:[#allocation0] sm:$0x1] %vm39_vm6, %v38_v21  }
  0x80   :  { %v44_v22 = vpop.permute.xlu0 %43   ;;  %v50_v23 = vpop.permute.xlu1 %49  }
  0x81   :  { %46 = vst.msk [vmem:[#allocation0] sm:$0x1] %vm45_vm7, %v44_v22  }
  0x82   :  { %52 = vst.msk [vmem:[#allocation0] sm:$0x1] %vm51_vm8, %v50_v23  }
  0x84   :  { %v56_v24 = vpop.permute.xlu0 %55   ;;  %v62_v25 = vpop.permute.xlu1 %61  }
  0x85   :  { %58 = vst.msk [vmem:[#allocation0] sm:$0x1] %vm57_vm9, %v56_v24  }
  0x86   :  { %64 = vst.msk [vmem:[#allocation0] sm:$0x1] %vm63_vm10, %v62_v25  }
  0x88   :  { %v68_v26 = vpop.permute.xlu0 %67   ;;  %v74_v27 = vpop.permute.xlu1 %73  }
  0x89   :  { %70 = vst.msk [vmem:[#allocation0] sm:$0x1] %vm69_vm11, %v68_v26  }
  0x8a   :  { %76 = vst.msk [vmem:[#allocation0] sm:$0x1] %vm75_vm12, %v74_v27  }
  0x8c   :  { %v80_v28 = vpop.permute.xlu0 %79   ;;  %v86_v29 = vpop.permute.xlu1 %85  }
  0x8d   :  { %82 = vst.msk [vmem:[#allocation0] sm:$0x1] %vm81_vm13, %v80_v28  }
  0x8e   :  { %88 = vst.msk [vmem:[#allocation0] sm:$0x1] %vm87_vm14, %v86_v29  }
  0x90   :  { %v92_v30 = vpop.permute.xlu0 %91  }
  0x91   :  { %94 = vst.msk [vmem:[#allocation0] sm:$0x1] %vm93_vm15, %v92_v30  }
  0x98   :  { %v98_v31 = vld [vmem:[#allocation0] sm:$0x1] }
  0x99   :  { %100 = vst [vmem:[%s208_s1] sm:$0x1] %v98_v31 }

// kernel: conv_norm_act.3
= control target key start
LH: loop header
LB: loop body
LE: loop exit
PB: predicated region body
PF: predicated region fallthrough
CT: control target
= control target key end

     0   :  { %s104_s0 = inlined_call_operand.vmem [shape: f32[32,128], index: 0, kind: input, shape index: {}, may-alias: {0,3}]   ;;  %s105_s1 = inlined_call_operand.vmem [shape: f32[1,128], index: 1, kind: input, shape index: {}]   ;;  %s106_s2 = inlined_call_operand.vmem [shape: f32[1,128], index: 2, kind: input, shape index: {}]   ;;  %s107_s3 = inlined_call_operand.vmem [shape: f32[32,128], index: 3, kind: output, shape index: {}, may-alias: {0,3}]  }
   0x1   :  { %v14_v0 = vld [vmem:[%s104_s0] sm:$0xff]  ;;  %v15_v4 = vld [vmem:[%s104_s0 + $0x8] sm:$0xff]  ;;  %v16_v5 = vld [vmem:[%s104_s0 + $0x10] sm:$0xff] }
   0x2   :  { %v52_v1 = vld [vmem:[%s105_s1] ss:$0 sm:$0xff]  ;;  %v17_v6 = vld [vmem:[%s104_s0 + $0x18] sm:$0xff] }
   0x3   :  { %v53_v2 = vld [vmem:[%s106_s2] ss:$0 sm:$0xff]  ;;  %v25_v3 = vmul.f32 %v52_v1, %v14_v0  ;;  %v26_v7 = vmul.f32 %v52_v1, %v15_v4  ;;  %v27_v8 = vmul.f32 %v52_v1, %v16_v5  ;;  %v28_v9 = vmul.f32 %v52_v1, %v17_v6 }
   0x5   :  { %v36_v10 = vadd.f32 %v53_v2, %v25_v3  ;;  %v37_v11 = vadd.f32 %v53_v2, %v26_v7  ;;  %v38_v12 = vadd.f32 %v53_v2, %v27_v8  ;;  %v39_v13 = vadd.f32 %v53_v2, %v28_v9 }
   0x7   :  { %v40_v14 = vmax.f32 %v36_v10, 0.0  ;;  %v41_v15 = vmax.f32 %v37_v11, 0.0  ;;  %v42_v16 = vmax.f32 %v38_v12, 0.0  ;;  %v43_v17 = vmax.f32 %v39_v13, 0.0 }
   0x9   :  { %44 = vst [vmem:[%s107_s3] sm:$0xff] %v40_v14  ;;  %45 = vst [vmem:[%s107_s3 + $0x8] sm:$0xff] %v41_v15 }
   0xa   :  { %46 = vst [vmem:[%s107_s3 + $0x10] sm:$0xff] %v42_v16  ;;  %47 = vst [vmem:[%s107_s3 + $0x18] sm:$0xff] %v43_v17 }

</bundles_post_ra>
